<compile_context>
chip_gen: v7x
topology: tpu7x:2x2x1
jax: 0.10.0
libtpu: 0.0.40
codegen_flags: <defaults>
</compile_context>

<pallas_src>
import functools
import math

import jax
import jax.numpy as jnp
from jax.experimental import pallas as pl
from jax.experimental.pallas import tpu as pltpu


def _copy_kernel(x_ref, o_ref):
    # Identity copy of one (tile_rows, cols) VMEM tile.  Purely HBM/DMA bound:
    # no MXU/VPU/EUP work, so only bytes moved and DMA shape matter.
    o_ref[...] = x_ref[...]


def _resolve_shape(shape, total):
    """Resolve a single -1 in `shape`, like torch .view."""
    shape = list(shape)
    if -1 in shape:
        idx = shape.index(-1)
        known = math.prod(s for s in shape if s != -1)
        if known > 0:
            assert total % known == 0, "view shape incompatible with input size"
            shape[idx] = total // known
        else:
            # Zero-element edge case: any value works; use 0.
            shape[idx] = 0
    assert math.prod(shape) == total, "view shape incompatible with input size"
    return tuple(shape)


def _pick_cols(total):
    """Widest lane-dense column count (multiple of 128) dividing `total`."""
    for c in (4096, 2048, 1024, 512, 256, 128):
        if total % c == 0:
            return c
    return None


@functools.lru_cache(maxsize=None)
def _build_copy(rows, cols, tile_rows, dtype_name, vmem_limit_bytes):
    """Build + jit the identity-copy pallas_call once per unique signature."""
    dtype = jnp.dtype(dtype_name)
    copy = pl.pallas_call(
        _copy_kernel,
        out_shape=jax.ShapeDtypeStruct((rows, cols), dtype),
        grid_spec=pltpu.PrefetchScalarGridSpec(
            num_scalar_prefetch=0,
            grid=(pl.cdiv(rows, tile_rows),),
            in_specs=[pl.BlockSpec((tile_rows, cols), lambda i: (i, 0))],
            out_specs=pl.BlockSpec((tile_rows, cols), lambda i: (i, 0)),
        ),
        compiler_params=pltpu.CompilerParams(
            # Pure DMA-bound copy; parallel vs arbitrary is measured-neutral
            # and we make no claim about cross-TC sharding on v7x.
            dimension_semantics=("arbitrary",),
            # Pipeline holds ~2(in+out) x 2(double-buffer) x block_bytes.
            vmem_limit_bytes=int(vmem_limit_bytes),
        ),
    )
    return jax.jit(copy)


def reshape_pallas(x, shape, *, force_pallas_copy=False,
                   target_block_bytes=8 << 20):
    """Equivalent of torch Reshape(shape).forward(x): x.view(shape).

    Default path is the metadata-only jnp.reshape (zero HBM traffic).  Set
    force_pallas_copy=True to route the bytes through the Pallas identity-copy
    kernel (demonstration / testing only).
    """
    total = math.prod(x.shape)
    out_shape = _resolve_shape(shape, total)

    if not force_pallas_copy:
        # Metadata-only: the correct production path for a contiguous reshape.
        return jnp.reshape(x, out_shape)

    cols = _pick_cols(total)
    if cols is None or total == 0:
        # Not 128-lane alignable (or empty): a pad+copy+slice round trip would
        # only add HBM traffic, so do the metadata reshape directly.
        return jnp.reshape(x, out_shape)

    rows = total // cols
    itemsize = jnp.dtype(x.dtype).itemsize
    # dtype-aware sublane packing: f32 -> 8, bf16 -> 16, int8/fp8 -> 32 rows.
    pack = max(8, 32 // max(1, itemsize))

    if rows <= pack:
        # Small input: single full-array block (always a legal block shape).
        tile_rows = rows
    else:
        # ~target_block_bytes per block, rounded to the packed sublane tile.
        tile_rows = max(pack, (target_block_bytes // (cols * itemsize)) // pack * pack)
        tile_rows = min(tile_rows, (rows // pack) * pack)

    block_bytes = tile_rows * cols * itemsize
    # 2 buffers (in+out) x double-buffering + headroom; stays well under the
    # 64 MiB/TC VMEM of v7x and explicitly above v5e's 16 MiB scoped default.
    vmem_limit_bytes = min(4 * block_bytes + (4 << 20), 48 << 20)

    copy = _build_copy(rows, cols, tile_rows, jnp.dtype(x.dtype).name,
                       vmem_limit_bytes)
    copied = copy(jnp.reshape(x, (rows, cols)))
    return jnp.reshape(copied, out_shape)


if __name__ == "__main__":
    key = jax.random.PRNGKey(0)

    # Small input consistent with a CSVAE encoder feature map: NCHW (2, 4, 16, 16)
    x = jax.random.normal(key, (2, 4, 16, 16), dtype=jnp.float32)
    target_shape = (-1, 4 * 16 * 16)
    y_ref = jnp.reshape(x, _resolve_shape(target_shape, x.size))

    # Default (production) path: metadata-only reshape, zero HBM traffic.
    y_meta = reshape_pallas(x, target_shape)
    jax.block_until_ready(y_meta)
    assert y_meta.shape == (2, 1024), y_meta.shape
    assert jnp.array_equal(y_meta, y_ref), "mismatch on metadata path"

    # Demonstration path: route the bytes through the Pallas identity-copy kernel.
    y_copy = reshape_pallas(x, target_shape, force_pallas_copy=True)
    jax.block_until_ready(y_copy)
    assert y_copy.shape == (2, 1024), y_copy.shape
    assert jnp.array_equal(y_copy, y_ref), "mismatch on pallas-copy path"

    # Exercise the multi-block (grid > 1) tiled copy path with small blocks.
    x2 = jax.random.normal(jax.random.PRNGKey(1), (8, 8, 32, 32), dtype=jnp.float32)
    y2 = reshape_pallas(x2, (8, -1), force_pallas_copy=True,
                        target_block_bytes=32 * 1024)
    jax.block_until_ready(y2)
    assert y2.shape == (8, 8192), y2.shape
    assert jnp.array_equal(y2, jnp.reshape(x2, (8, 8192))), "mismatch on tiled path"

    # Re-invoking with the same signature must hit the lru_cache (no re-trace).
    y_copy2 = reshape_pallas(x, target_shape, force_pallas_copy=True)
    jax.block_until_ready(y_copy2)
    assert jnp.array_equal(y_copy2, y_ref)

    print("KERNEL_OK")
</pallas_src>

<mosaic_0001>
module attributes {stable_mosaic.version = 11 : i64} {
  func.func @_copy_kernel(%arg0: i32, %arg1: memref<1x2048xf32, #tpu.memory_space<vmem>>, %arg2: memref<1x2048xf32, #tpu.memory_space<vmem>>) attributes {dimension_semantics = [#tpu.dimension_semantics<arbitrary>], iteration_bounds = array<i64: 1>, scalar_prefetch = 0 : i64, scratch_operands = 0 : i64, tpu.core_type = #tpu.core_type<tc>, window_params = [{transform_indices = @transform_0, window_bounds = array<i64: 1, 2048>}, {transform_indices = @transform_1, window_bounds = array<i64: 1, 2048>}]} {
    %c0 = arith.constant 0 : index
    %c0_0 = arith.constant 0 : index
    %0 = vector.load %arg1[%c0, %c0_0] : memref<1x2048xf32, #tpu.memory_space<vmem>>, vector<1x2048xf32>
    %c0_1 = arith.constant 0 : index
    %c0_2 = arith.constant 0 : index
    %1 = vector.load %arg2[%c0_1, %c0_2] : memref<1x2048xf32, #tpu.memory_space<vmem>>, vector<1x2048xf32>
    tpu.vector_store %arg2[%c0_1, %c0_2], %0 {strides = array<i32>} : memref<1x2048xf32, #tpu.memory_space<vmem>>, vector<1x2048xf32>,
    return
  }
  func.func @transform_0(%arg0: i32) -> (i32, i32) {
    %c0_i32 = arith.constant 0 : i32
    %c0_i32_0 = arith.constant 0 : i32
    return %arg0, %c0_i32 : i32, i32
  }
  func.func @transform_1(%arg0: i32) -> (i32, i32) {
    %c0_i32 = arith.constant 0 : i32
    %c0_i32_0 = arith.constant 0 : i32
    return %arg0, %c0_i32 : i32, i32
  }
}

</mosaic_0001>

<bundles_post_ra>
// kernel: tpu_custom_call.1
= control target key start
LH: loop header
LB: loop body
LE: loop exit
PB: predicated region body
PF: predicated region fallthrough
CT: control target
= control target key end

     0   :  { %6 = vsyncpa [#allocation3], 0  ;;  %s126_s0 = inlined_call_operand.hbm [shape: f32[1,2048], index: 0, kind: input, shape index: {}]   ;;  %s127_s1 = inlined_call_operand.hbm [shape: f32[1,2048], index: 1, kind: output, shape index: {}]  }
   0x1   :  { %7 = vsyncpa [#allocation4], 0  ;;  %s90_s6 = smov [#allocation2]   ;;  %s42_s10 = scalar_lea.hbm %s126_s0, 256 }
   0x2   :  { %s14_s7 = sshll.u32 %s90_s6, 4  ;;  %p43_p0 = scmp.ne.s32.totalorder %s126_s0, %s42_s10  ;;  %s15_s7 = int_to_ptr.vmem [resolvable:$true] %s14_s7 }
   0x3   :  { %p46_p1 = scmp.lt.u32.totalorder %s42_s10, %s126_s0 }
   0x5   :  { %p48_p2 = pnand %p46_p1, %p43_p0 }
   0x7   :  { %51 = shalt.err (!%p48_p2)
}
   0x8   :  { %s52_s15 = scalar_lea.vmem %s15_s7, 256  ;;  %p57_p4 = scmp.lt.s32.totalorder %s15_s7, %s15_s7 }
   0x9   :  { %p53_p3 = scmp.ne.s32.totalorder %s15_s7, %s52_s15  ;;  %p58_p5 = scmp.lt.s32.totalorder %s52_s15, %s52_s15 }
   0xb   :  { %p59_p6 = por %p58_p5, %p57_p4 }
   0xd   :  { %p60_p7 = pnand %p59_p6, %p53_p3 }
   0xf   :  { %63 = shalt.err (!%p60_p7)
}
  0x10   :  { %17 = dma.hbm_to_vmem [thread:$0]  %s126_s0, 256, %s15_s7, [#allocation3]  }
  0x11   :  { %86 = dma.done.wait [#allocation3], 256  }
  0x12   :  { %87 = vsyncadd [#allocation3], 4294967040  ;;  %s91_s18 = smov [#allocation5]   ;;  %v21_v0 = vld [vmem:[#allocation2] sm:$0xff]  ;;  %v22_v1 = vld [vmem:[#allocation2 + $0x8] sm:$0xff] }
  0x13   :  { %s31_s19 = sshll.u32 %s91_s18, 4  ;;  %23 = vst [vmem:[#allocation5] sm:$0xff] %v21_v0  ;;  %24 = vst [vmem:[#allocation5 + $0x8] sm:$0xff] %v22_v1  ;;  %s32_s19 = int_to_ptr.vmem [resolvable:$true] %s31_s19 }
  0x14   :  { %s64_s20 = scalar_lea.vmem %s32_s19, 256  ;;  %p69_p9 = scmp.lt.s32.totalorder %s32_s19, %s32_s19 }
  0x15   :  { %p65_p8 = scmp.ne.s32.totalorder %s32_s19, %s64_s20  ;;  %p70_p10 = scmp.lt.s32.totalorder %s64_s20, %s64_s20 }
  0x17   :  { %p71_p11 = por %p70_p10, %p69_p9 }
  0x19   :  { %p72_p12 = pnand %p71_p11, %p65_p8 }
  0x1b   :  { %75 = shalt.err (!%p72_p12)
}
  0x1c   :  { %s76_s0 = scalar_lea.hbm %s127_s1, 256 }
  0x1d   :  { %p77_p13 = scmp.ne.s32.totalorder %s127_s1, %s76_s0  ;;  %p80_p0 = scmp.lt.u32.totalorder %s76_s0, %s127_s1 }
  0x1f   :  { %p82_p1 = pnand %p80_p0, %p77_p13 }
  0x21   :  { %85 = shalt.err (!%p82_p1)
}
  0x22   :  { %34 = dma.vmem_to_hbm [thread:$0]  %s32_s19, 256, %s127_s1, [#allocation4]  }
  0x23   :  { %88 = dma.done.wait [#allocation4], 256  }
  0x24   :  { %89 = vsyncadd [#allocation4], 4294967040 }
  0x25   :  { %38 = vsyncpa [#allocation3], 1 }
  0x26   :  { %39 = vsyncpa [#allocation4], 1 }

</bundles_post_ra>
